<compile_context>
chip_gen: v7x
topology: tpu7x:2x2x1
jax: 0.10.0
libtpu: 0.0.40
codegen_flags: <defaults>
</compile_context>

<pallas_src>
import functools
import math

import jax
import jax.numpy as jnp
from jax.experimental import pallas as pl
from jax.experimental.pallas import tpu as pltpu


def _round_up(x, m):
    return ((x + m - 1) // m) * m


def _pad_rows(x, rows_padded):
    rows = x.shape[0]
    if rows_padded == rows:
        return x
    return jnp.pad(x, ((0, rows_padded - rows), (0, 0)))


# ----------------------------------------------------------------------------
# Linear (y = x @ w + b), tiled matmul with f32 accumulator.
# Used once for the fused QKV projection (N = 3*H).
# ----------------------------------------------------------------------------
def _linear_kernel(x_ref, w_ref, b_ref, o_ref, acc_ref):
    k = pl.program_id(2)

    @pl.when(k == 0)
    def _():
        acc_ref[...] = jnp.zeros_like(acc_ref)

    acc_ref[...] += jnp.dot(
        x_ref[...], w_ref[...], preferred_element_type=jnp.float32
    )

    @pl.when(k == pl.num_programs(2) - 1)
    def _():
        o_ref[...] = (acc_ref[...] + b_ref[...].astype(jnp.float32)).astype(o_ref.dtype)


def linear(x, w, b, *, tm=256, tk=512, tn=256):
    """x: (M, K), w: (K, N), b: (N,) -> (M, N). Rows padded, never collapsed."""
    M, K = x.shape
    Kw, N = w.shape
    assert K == Kw

    tm = min(tm, _round_up(M, 8))
    Mp = _round_up(M, tm)
    tk = tk if (K > tk and K % tk == 0) else K
    tn = tn if (N > tn and N % tn == 0) else N

    x = _pad_rows(x, Mp)
    b2 = b.reshape(1, N)

    itemsize = x.dtype.itemsize
    blk_bytes = (tm * tk + tk * tn + tm * tn + tn) * itemsize + tm * tn * 4
    vmem_limit = int(min(max(4 * blk_bytes, 16 << 20), 48 << 20))

    grid = (Mp // tm, N // tn, K // tk)
    out = pl.pallas_call(
        _linear_kernel,
        out_shape=jax.ShapeDtypeStruct((Mp, N), x.dtype),
        grid_spec=pltpu.PrefetchScalarGridSpec(
            num_scalar_prefetch=0,
            grid=grid,
            in_specs=[
                pl.BlockSpec((tm, tk), lambda i, j, k: (i, k)),
                pl.BlockSpec((tk, tn), lambda i, j, k: (k, j)),
                pl.BlockSpec((1, tn), lambda i, j, k: (0, j)),
            ],
            out_specs=pl.BlockSpec((tm, tn), lambda i, j, k: (i, j)),
            scratch_shapes=[pltpu.VMEM((tm, tn), jnp.float32)],
        ),
        compiler_params=pltpu.CompilerParams(
            dimension_semantics=("parallel", "parallel", "arbitrary"),
            vmem_limit_bytes=vmem_limit,
        ),
    )(x, w, b2)
    return out[:M]


# ----------------------------------------------------------------------------
# Multi-head attention (flash-style online softmax, additive mask bias).
# ----------------------------------------------------------------------------
def _attn_kernel(q_ref, k_ref, v_ref, mb_ref, o_ref, m_sc, l_sc, acc_sc, *, sm_scale):
    kv = pl.program_id(2)

    @pl.when(kv == 0)
    def _():
        m_sc[...] = jnp.full_like(m_sc, -jnp.inf)
        l_sc[...] = jnp.zeros_like(l_sc)
        acc_sc[...] = jnp.zeros_like(acc_sc)

    q = q_ref[0].astype(jnp.float32) * sm_scale      # (tq, Dh)
    k = k_ref[0].astype(jnp.float32)                 # (tkv, Dh)
    v = v_ref[0].astype(jnp.float32)                 # (tkv, Dh)

    s = jax.lax.dot_general(q, k, (((1,), (1,)), ((), ())),
                            preferred_element_type=jnp.float32)   # (tq, tkv)
    s = s + mb_ref[0].astype(jnp.float32)            # (1, tkv) broadcast over rows

    m_prev = m_sc[...]
    m_new = jnp.maximum(m_prev, s.max(axis=-1, keepdims=True))
    alpha = jnp.exp(m_prev - m_new)
    p = jnp.exp(s - m_new)
    l_sc[...] = alpha * l_sc[...] + p.sum(axis=-1, keepdims=True)
    acc_sc[...] = alpha * acc_sc[...] + jnp.dot(p, v, preferred_element_type=jnp.float32)
    m_sc[...] = m_new

    @pl.when(kv == pl.num_programs(2) - 1)
    def _():
        o_ref[0] = (acc_sc[...] / l_sc[...]).astype(o_ref.dtype)


def multi_head_attention(qh, kh, vh, mask_bias, *, num_heads, sm_scale):
    """qh/kh/vh: (B*num_heads, S, Dh); mask_bias: (B, 1, S) additive bias."""
    BH, S, Dh = qh.shape
    tq = 256 if (S > 256 and S % 256 == 0) else S
    tkv = 512 if (S > 512 and S % 512 == 0) else S

    itemsize = qh.dtype.itemsize
    blk_bytes = (tq * Dh + 2 * tkv * Dh + tkv) * itemsize + (2 * tq + tq * Dh) * 4
    vmem_limit = int(min(max(6 * blk_bytes, 16 << 20), 48 << 20))

    grid = (BH, S // tq, S // tkv)
    return pl.pallas_call(
        functools.partial(_attn_kernel, sm_scale=sm_scale),
        out_shape=jax.ShapeDtypeStruct((BH, S, Dh), qh.dtype),
        grid_spec=pltpu.PrefetchScalarGridSpec(
            num_scalar_prefetch=0,
            grid=grid,
            in_specs=[
                pl.BlockSpec((1, tq, Dh), lambda bh, qi, kv: (bh, qi, 0)),
                pl.BlockSpec((1, tkv, Dh), lambda bh, qi, kv: (bh, kv, 0)),
                pl.BlockSpec((1, tkv, Dh), lambda bh, qi, kv: (bh, kv, 0)),
                pl.BlockSpec((1, 1, tkv),
                             lambda bh, qi, kv: (bh // num_heads, 0, kv)),
            ],
            out_specs=pl.BlockSpec((1, tq, Dh), lambda bh, qi, kv: (bh, qi, 0)),
            scratch_shapes=[
                pltpu.VMEM((tq, 1), jnp.float32),
                pltpu.VMEM((tq, 1), jnp.float32),
                pltpu.VMEM((tq, Dh), jnp.float32),
            ],
        ),
        compiler_params=pltpu.CompilerParams(
            dimension_semantics=("parallel", "parallel", "arbitrary"),
            vmem_limit_bytes=vmem_limit,
        ),
    )(qh, kh, vh, mask_bias)


# ----------------------------------------------------------------------------
# Fused output projection + bias + residual add + RMSNorm.
#   out = scale * rmsnorm(ctx @ Wo + bo + residual)
# The full hidden dim H sits in one lane-dense output tile, so the norm can be
# computed in-kernel on the final reduction step -- no extra HBM round-trip.
# ----------------------------------------------------------------------------
def _out_norm_kernel(x_ref, w_ref, b_ref, r_ref, s_ref, o_ref, acc_ref, *, eps):
    k = pl.program_id(1)

    @pl.when(k == 0)
    def _():
        acc_ref[...] = jnp.zeros_like(acc_ref)

    acc_ref[...] += jnp.dot(
        x_ref[...], w_ref[...], preferred_element_type=jnp.float32
    )

    @pl.when(k == pl.num_programs(1) - 1)
    def _():
        x = acc_ref[...] + b_ref[...].astype(jnp.float32) + r_ref[...].astype(jnp.float32)
        ms = jnp.mean(x * x, axis=-1, keepdims=True)
        xn = x * jax.lax.rsqrt(ms + eps)
        o_ref[...] = (s_ref[...].astype(jnp.float32) * xn).astype(o_ref.dtype)


def output_proj_add_rmsnorm(ctx2d, w, b, residual2d, scale, *, eps,
                            tm=256, tk=512):
    """ctx2d: (M, K), w: (K, H), b: (H,), residual2d: (M, H), scale: (H,)."""
    M, K = ctx2d.shape
    Kw, H = w.shape
    assert K == Kw

    tm = min(tm, _round_up(M, 8))
    Mp = _round_up(M, tm)
    tk = tk if (K > tk and K % tk == 0) else K

    x = _pad_rows(ctx2d, Mp)
    r = _pad_rows(residual2d, Mp)
    b2 = b.reshape(1, H)
    s2 = scale.reshape(1, H)

    itemsize = x.dtype.itemsize
    blk_bytes = (tm * tk + tk * H + 2 * tm * H + 2 * H) * itemsize + tm * H * 4
    vmem_limit = int(min(max(4 * blk_bytes, 16 << 20), 48 << 20))

    grid = (Mp // tm, K // tk)
    out = pl.pallas_call(
        functools.partial(_out_norm_kernel, eps=eps),
        out_shape=jax.ShapeDtypeStruct((Mp, H), x.dtype),
        grid_spec=pltpu.PrefetchScalarGridSpec(
            num_scalar_prefetch=0,
            grid=grid,
            in_specs=[
                pl.BlockSpec((tm, tk), lambda i, k: (i, k)),
                pl.BlockSpec((tk, H), lambda i, k: (k, 0)),
                pl.BlockSpec((1, H), lambda i, k: (0, 0)),
                pl.BlockSpec((tm, H), lambda i, k: (i, 0)),
                pl.BlockSpec((1, H), lambda i, k: (0, 0)),
            ],
            out_specs=pl.BlockSpec((tm, H), lambda i, k: (i, 0)),
            scratch_shapes=[pltpu.VMEM((tm, H), jnp.float32)],
        ),
        compiler_params=pltpu.CompilerParams(
            dimension_semantics=("parallel", "arbitrary"),
            vmem_limit_bytes=vmem_limit,
        ),
        cost_estimate=pl.CostEstimate(
            flops=int(2 * M * K * H + 6 * M * H),
            transcendentals=int(M),
            bytes_accessed=int((M * K + K * H + 3 * M * H + 2 * H) * itemsize),
        ),
    )(x, w, b2, r, s2)
    return out[:M]


# ----------------------------------------------------------------------------
# Full SCAAttention forward (inference).
# ----------------------------------------------------------------------------
def sca_attention_forward(hidden_states, params, *, num_heads, eps,
                          attention_mask=None):
    B, S, H = hidden_states.shape
    Dh = H // num_heads
    x2d = hidden_states.reshape(B * S, H)

    # Fused Q/K/V projection: x streamed once, one kernel launch, N = 3H.
    wqkv = jnp.concatenate([params["wq"], params["wk"], params["wv"]], axis=1)
    bqkv = jnp.concatenate([params["bq"], params["bk"], params["bv"]], axis=0)
    qkv = linear(x2d, wqkv, bqkv)
    q, k, v = qkv[:, :H], qkv[:, H:2 * H], qkv[:, 2 * H:]

    def to_heads(t):
        return (t.reshape(B, S, num_heads, Dh)
                 .transpose(0, 2, 1, 3)
                 .reshape(B * num_heads, S, Dh))

    qh, kh, vh = to_heads(q), to_heads(k), to_heads(v)

    # TODO(synk): 2D RoPE (indices_x/indices_y) and using_1d paths are not implemented;
    # with the module defaults (indices_x=indices_y=None, using_1d=False) rope2d is the
    # identity, which is what is reproduced here.

    if attention_mask is not None:
        am = attention_mask[..., :512].astype(jnp.float32)
        mask_bias = (1.0 - am) * -10000.0
    else:
        mask_bias = jnp.zeros((B, S), jnp.float32)
    mask_bias = mask_bias.reshape(B, 1, S)

    ctx = multi_head_attention(qh, kh, vh, mask_bias,
                               num_heads=num_heads,
                               sm_scale=1.0 / math.sqrt(Dh))
    # TODO(synk): attn_dropout / out_dropout are inference-mode identities here.

    ctx = (ctx.reshape(B, num_heads, S, Dh)
              .transpose(0, 2, 1, 3)
              .reshape(B * S, H))

    # Fused: Output projection + residual add + RMSNorm in a single kernel.
    out = output_proj_add_rmsnorm(ctx, params["wo"], params["bo"], x2d,
                                  params["norm_scale"], eps=eps)
    return out.reshape(B, S, H)


# ----------------------------------------------------------------------------
# Pure-JAX reference mirroring the PyTorch module (eval mode).
# ----------------------------------------------------------------------------
def sca_attention_ref(hidden_states, params, *, num_heads, eps,
                      attention_mask=None):
    B, S, H = hidden_states.shape
    Dh = H // num_heads
    q = hidden_states @ params["wq"] + params["bq"]
    k = hidden_states @ params["wk"] + params["bk"]
    v = hidden_states @ params["wv"] + params["bv"]

    def heads(t):
        return t.reshape(B, S, num_heads, Dh).transpose(0, 2, 1, 3)

    q, k, v = heads(q), heads(k), heads(v)
    scores = (q / math.sqrt(Dh)) @ jnp.swapaxes(k, -1, -2)
    if attention_mask is not None:
        am = attention_mask[..., :512].astype(jnp.float32)
        scores = scores + ((1.0 - am) * -10000.0)[:, None, None, :]
    probs = jax.nn.softmax(scores, axis=-1)
    ctx = probs @ v
    ctx = ctx.transpose(0, 2, 1, 3).reshape(B, S, H)
    ctx = ctx @ params["wo"] + params["bo"]
    x = ctx + hidden_states
    ms = jnp.mean(x * x, axis=-1, keepdims=True)
    return params["norm_scale"] * x * jax.lax.rsqrt(ms + eps)


if __name__ == "__main__":
    key = jax.random.PRNGKey(0)
    B, S, H, num_heads = 2, 8, 32, 4
    eps = 1e-5

    ks = jax.random.split(key, 10)
    w_scale = 1.0 / math.sqrt(H)
    params = {
        "wq": jax.random.normal(ks[0], (H, H), jnp.float32) * w_scale,
        "bq": jax.random.normal(ks[1], (H,), jnp.float32) * 0.1,
        "wk": jax.random.normal(ks[2], (H, H), jnp.float32) * w_scale,
        "bk": jax.random.normal(ks[3], (H,), jnp.float32) * 0.1,
        "wv": jax.random.normal(ks[4], (H, H), jnp.float32) * w_scale,
        "bv": jax.random.normal(ks[5], (H,), jnp.float32) * 0.1,
        "wo": jax.random.normal(ks[6], (H, H), jnp.float32) * w_scale,
        "bo": jax.random.normal(ks[7], (H,), jnp.float32) * 0.1,
        "norm_scale": jnp.ones((H,), jnp.float32),  # nn.Parameter(torch.ones(size))
    }

    hidden_states = jax.random.normal(ks[8], (B, S, H), jnp.float32)
    attention_mask = jnp.ones((B, S), jnp.float32).at[1, 6:].set(0.0)

    out = sca_attention_forward(hidden_states, params, num_heads=num_heads,
                                eps=eps, attention_mask=attention_mask)
    out = jax.block_until_ready(out)

    ref = sca_attention_ref(hidden_states, params, num_heads=num_heads,
                            eps=eps, attention_mask=attention_mask)
    assert out.shape == hidden_states.shape
    assert jnp.allclose(out, ref, atol=1e-4, rtol=1e-4), \
        float(jnp.max(jnp.abs(out - ref)))

    print("KERNEL_OK")
</pallas_src>

<mosaic_0001>
module attributes {stable_mosaic.version = 11 : i64} {
  func.func @_linear_kernel(%arg0: i32, %arg1: i32, %arg2: i32, %arg3: memref<16x32xf32, #tpu.memory_space<vmem>>, %arg4: memref<32x96xf32, #tpu.memory_space<vmem>>, %arg5: memref<1x96xf32, #tpu.memory_space<vmem>>, %arg6: memref<16x96xf32, #tpu.memory_space<vmem>>, %arg7: memref<16x96xf32, #tpu.memory_space<vmem>>) attributes {dimension_semantics = [#tpu.dimension_semantics<parallel>, #tpu.dimension_semantics<parallel>, #tpu.dimension_semantics<arbitrary>], iteration_bounds = array<i64: 1, 1, 1>, scalar_prefetch = 0 : i64, scratch_operands = 1 : i64, tpu.core_type = #tpu.core_type<tc>, window_params = [{transform_indices = @transform_0, window_bounds = array<i64: 16, 32>}, {transform_indices = @transform_1, window_bounds = array<i64: 32, 96>}, {transform_indices = @transform_2, window_bounds = array<i64: 1, 96>}, {transform_indices = @transform_3, window_bounds = array<i64: 16, 96>}]} {
    %c0_i32 = arith.constant 0 : i32
    %0 = arith.cmpi eq, %arg2, %c0_i32 : i32
    %1 = arith.extui %0 : i1 to i32
    %c0_i32_0 = arith.constant 0 : i32
    %2 = arith.cmpi ne, %1, %c0_i32_0 : i32
    scf.if %2 {
      %cst_10 = arith.constant 0.000000e+00 : f32
      %12 = vector.broadcast %cst_10 : f32 to vector<16x96xf32>
      %c0_11 = arith.constant 0 : index
      %c0_12 = arith.constant 0 : index
      %13 = vector.load %arg7[%c0_11, %c0_12] : memref<16x96xf32, #tpu.memory_space<vmem>>, vector<16x96xf32>
      tpu.vector_store %arg7[%c0_11, %c0_12], %12 {strides = array<i32>} : memref<16x96xf32, #tpu.memory_space<vmem>>, vector<16x96xf32>,
    } else {
    }
    %c0 = arith.constant 0 : index
    %c0_1 = arith.constant 0 : index
    %3 = vector.load %arg7[%c0, %c0_1] : memref<16x96xf32, #tpu.memory_space<vmem>>, vector<16x96xf32>
    %c0_2 = arith.constant 0 : index
    %c0_3 = arith.constant 0 : index
    %4 = vector.load %arg3[%c0_2, %c0_3] : memref<16x32xf32, #tpu.memory_space<vmem>>, vector<16x32xf32>
    %c0_4 = arith.constant 0 : index
    %c0_5 = arith.constant 0 : index
    %5 = vector.load %arg4[%c0_4, %c0_5] : memref<32x96xf32, #tpu.memory_space<vmem>>, vector<32x96xf32>
    %cst = arith.constant dense<0.000000e+00> : vector<16x96xf32>
    %6 = tpu.matmul %4, %5, %cst {dimension_numbers = #tpu.dot_dimension_numbers<[1], [0], [0], [1], [0, 0, 1, 1], [], []>} : vector<16x32xf32>, vector<32x96xf32>, vector<16x96xf32> -> vector<16x96xf32>
    %7 = arith.addf %3, %6 : vector<16x96xf32>
    %c0_6 = arith.constant 0 : index
    %c0_7 = arith.constant 0 : index
    %8 = vector.load %arg7[%c0_6, %c0_7] : memref<16x96xf32, #tpu.memory_space<vmem>>, vector<16x96xf32>
    tpu.vector_store %arg7[%c0_6, %c0_7], %7 {strides = array<i32>} : memref<16x96xf32, #tpu.memory_space<vmem>>, vector<16x96xf32>,
    %c0_i32_8 = arith.constant 0 : i32
    %9 = arith.cmpi eq, %arg2, %c0_i32_8 : i32
    %10 = arith.extui %9 : i1 to i32
    %c0_i32_9 = arith.constant 0 : i32
    %11 = arith.cmpi ne, %10, %c0_i32_9 : i32
    scf.if %11 {
      %c0_10 = arith.constant 0 : index
      %c0_11 = arith.constant 0 : index
      %12 = vector.load %arg7[%c0_10, %c0_11] : memref<16x96xf32, #tpu.memory_space<vmem>>, vector<16x96xf32>
      %c0_12 = arith.constant 0 : index
      %c0_13 = arith.constant 0 : index
      %13 = vector.load %arg5[%c0_12, %c0_13] : memref<1x96xf32, #tpu.memory_space<vmem>>, vector<1x96xf32>
      %14 = vector.broadcast %13 : vector<1x96xf32> to vector<16x96xf32>
      %15 = arith.addf %12, %14 : vector<16x96xf32>
      %c0_14 = arith.constant 0 : index
      %c0_15 = arith.constant 0 : index
      %16 = vector.load %arg6[%c0_14, %c0_15] : memref<16x96xf32, #tpu.memory_space<vmem>>, vector<16x96xf32>
      tpu.vector_store %arg6[%c0_14, %c0_15], %15 {strides = array<i32>} : memref<16x96xf32, #tpu.memory_space<vmem>>, vector<16x96xf32>,
    } else {
    }
    return
  }
  func.func @transform_0(%arg0: i32, %arg1: i32, %arg2: i32) -> (i32, i32) {
    %c0_i32 = arith.constant 0 : i32
    return %arg0, %arg2 : i32, i32
  }
  func.func @transform_1(%arg0: i32, %arg1: i32, %arg2: i32) -> (i32, i32) {
    %c0_i32 = arith.constant 0 : i32
    return %arg2, %arg1 : i32, i32
  }
  func.func @transform_2(%arg0: i32, %arg1: i32, %arg2: i32) -> (i32, i32) {
    %c0_i32 = arith.constant 0 : i32
    %c0_i32_0 = arith.constant 0 : i32
    return %c0_i32, %arg1 : i32, i32
  }
  func.func @transform_3(%arg0: i32, %arg1: i32, %arg2: i32) -> (i32, i32) {
    %c0_i32 = arith.constant 0 : i32
    return %arg0, %arg1 : i32, i32
  }
}

</mosaic_0001>

<bundles_post_ra>
// kernel: tpu_custom_call.1
= control target key start
LH: loop header
LB: loop body
LE: loop exit
PB: predicated region body
PF: predicated region fallthrough
CT: control target
= control target key end

     0   :  { %8 = vsyncpa [#allocation4], 0  ;;  %s365_s0 = inlined_call_operand.hbm [shape: f32[16,32], index: 0, kind: input, shape index: {}]   ;;  %s366_s1 = inlined_call_operand.hbm [shape: f32[32,96], index: 1, kind: input, shape index: {}]   ;;  %s367_s2 = inlined_call_operand.vmem [shape: f32[1,96], index: 2, kind: input, shape index: {}]   ;;  %s368_s3 = inlined_call_operand.hbm [shape: f32[16,96], index: 3, kind: output, shape index: {}]  }
   0x1   :  { %9 = vsyncpa [#allocation7], 0 }
   0x2   :  { %10 = vsyncpa [#allocation5], 0  ;;  %s285_s12 = smov [#allocation3]   ;;  %s213_s16 = scalar_lea.hbm %s365_s0, 256 }
   0x3   :  { %s16_s13 = sshll.u32 %s285_s12, 4  ;;  %p214_p0 = scmp.ne.s32.totalorder %s365_s0, %s213_s16  ;;  %s17_s13 = int_to_ptr.vmem [resolvable:$true] %s16_s13 }
   0x4   :  { %p217_p1 = scmp.lt.u32.totalorder %s213_s16, %s365_s0 }
   0x6   :  { %p219_p2 = pnand %p217_p1, %p214_p0 }
   0x8   :  { %222 = shalt.err (!%p219_p2)
}
   0x9   :  { %s223_s21 = scalar_lea.vmem %s17_s13, 256  ;;  %p228_p4 = scmp.lt.s32.totalorder %s17_s13, %s17_s13 }
   0xa   :  { %p224_p3 = scmp.ne.s32.totalorder %s17_s13, %s223_s21  ;;  %p229_p5 = scmp.lt.s32.totalorder %s223_s21, %s223_s21 }
   0xc   :  { %p230_p6 = por %p229_p5, %p228_p4 }
   0xe   :  { %p231_p7 = pnand %p230_p6, %p224_p3 }
  0x10   :  { %234 = shalt.err (!%p231_p7)
}
  0x11   :  { %s286_s22 = smov 128   ;;  %s287_s23 = smov 8  }
  0x12   :  { %22 = dma.hbm_to_vmem [thread:$0]  %s365_s0, 256, %s17_s13, [#allocation4], %s286_s22, %s286_s22, %s287_s23  }
  0x13   :  { %s288_s26 = smov [#allocation6]   ;;  %s235_s30 = scalar_lea.hbm %s366_s1, 512 }
  0x14   :  { %s28_s27 = sshll.u32 %s288_s26, 4  ;;  %p236_p8 = scmp.ne.s32.totalorder %s366_s1, %s235_s30  ;;  %s29_s27 = int_to_ptr.vmem [resolvable:$true] %s28_s27 }
  0x15   :  { %p239_p9 = scmp.lt.u32.totalorder %s235_s30, %s366_s1 }
  0x17   :  { %p241_p10 = pnand %p239_p9, %p236_p8 }
  0x19   :  { %244 = shalt.err (!%p241_p10)
}
  0x1a   :  { %s245_s8 = scalar_lea.vmem %s29_s27, 512  ;;  %p250_p12 = scmp.lt.s32.totalorder %s29_s27, %s29_s27 }
  0x1b   :  { %p246_p11 = scmp.ne.s32.totalorder %s29_s27, %s245_s8  ;;  %p251_p13 = scmp.lt.s32.totalorder %s245_s8, %s245_s8 }
  0x1d   :  { %p252_p0 = por %p251_p13, %p250_p12 }
  0x1f   :  { %p253_p1 = pnand %p252_p0, %p246_p11 }
  0x21   :  { %256 = shalt.err (!%p253_p1)
}
  0x22   :  { %34 = dma.hbm_to_vmem [thread:$0]  %s366_s1, 512, %s29_s27, [#allocation7], %s286_s22, %s286_s22, %s287_s23  }
  0x23   :  { %279 = dma.done.wait [#allocation4], 256  }
  0x24   :  { %280 = vsyncadd [#allocation4], 4294967040 }
  0x25   :  { %281 = dma.done.wait [#allocation7], 512  }
  0x26   :  { %282 = vsyncadd [#allocation7], 4294966784  ;;  %vm47_vm0 = vcmask 785408   ;;  %v289_v0 = vmov 0.0   ;;  %vm58_vm1 = vcmask 261120   ;;  %v54_v1 = vld [vmem:[#allocation6] sm:$0xff] }
  0x27   :  { %49 = vst.msk [vmem:[#allocation2 + $0x8] sm:$0xff] %vm47_vm0, %v289_v0  ;;  %48 = vst.msk [vmem:[#allocation2] sm:$0xff] %vm47_vm0, %v289_v0  ;;  %v55_v2 = vld [vmem:[#allocation6 + $0x8] sm:$0xff]  ;;  %v56_v3 = vld [vmem:[#allocation6 + $0x10] sm:$0xff]  ;;  %s290_s11 = smov [#allocation8]  }
  0x28   :  { %v199_v4 = vpack.c.bf16 %v55_v2, %v54_v1  ;;  %v57_v5 = vld [vmem:[#allocation6 + $0x18] sm:$0xff]  ;;  %v52_v6 = vld [vmem:[#allocation3] sm:$0xff]  ;;  %v181_v15 = vld [vmem:[%s367_s2] ss:$0 sm:$0xff]  ;;  %s166_s12 = sshll.u32 %s290_s11, 4  ;;  %s167_s12 = int_to_ptr.vmem [resolvable:$true] %s166_s12 }
  0x29   :  { %v203_v7 = vpack.c.bf16 %v57_v5, %v56_v3  ;;  %196 = vmatprep.mubr.msk.f32.mxu0 %vm58_vm1, %v52_v6  ;;  %v53_v8 = vld [vmem:[#allocation3 + $0x8] sm:$0xff]  ;;  %s257_s13 = scalar_lea.vmem %s167_s12, 256  ;;  %p262_p3 = scmp.lt.s32.totalorder %s167_s12, %s167_s12 }
  0x2a   :  { %200 = vmatprep.subr.bf16.mxu0 %v199_v4  ;;  %p258_p2 = scmp.ne.s32.totalorder %s167_s12, %s257_s13  ;;  %p263_p4 = scmp.lt.s32.totalorder %s257_s13, %s257_s13 }
  0x2b   :  { %202 = vmatpush3.bf16.msra.mxu0 %v199_v4 }
  0x2c   :  { %204 = vmatprep.subr.bf16.mxu0 %v203_v7  ;;  %p264_p5 = por %p263_p4, %p262_p3 }
  0x2e   :  { %v51_v9 = vld [vmem:[#allocation2 + $0x8] sm:$0xff]  ;;  %v50_v10 = vld [vmem:[#allocation2] sm:$0xff]  ;;  %p265_p6 = pnand %p264_p5, %p258_p2 }
  0x2f   :  { %206 = vmatpush3.bf16.msra.mxu0 %v203_v7 }
  0x32   :  { %197 = vmatmul.mubr.msk.f32.vlgmr.msra.gmra.mrb[0].mxu0 %vm58_vm1, %v53_v8 }
 0x105   :  { %v198_v11 = vpop.f32.mrb[0].mxu0 }
 0x106   :  { %v141_v12 = vadd.f32 %v198_v11, %v51_v9  ;;  %v131_v13 = vpop.f32.mrb[1].mxu0 }
 0x107   :  { %v140_v14 = vadd.f32 %v131_v13, %v50_v10 }
 0x108   :  { %144 = vst.msk [vmem:[#allocation2 + $0x8] sm:$0xff] %vm47_vm0, %v141_v12 }
 0x109   :  { %143 = vst.msk [vmem:[#allocation2] sm:$0xff] %vm47_vm0, %v140_v14 }
 0x10f   :  { %v149_v16 = vld [vmem:[#allocation2 + $0x8] sm:$0xff] }
 0x110   :  { %v148_v17 = vld [vmem:[#allocation2] sm:$0xff]  ;;  %v158_v18 = vadd.f32 %v181_v15, %v149_v16 }
 0x111   :  { %v157_v19 = vadd.f32 %v181_v15, %v148_v17 }
 0x112   :  { %160 = vst.msk [vmem:[#allocation8 + $0x8] sm:$0xff] %vm47_vm0, %v158_v18 }
 0x113   :  { %159 = vst.msk [vmem:[#allocation8] sm:$0xff] %vm47_vm0, %v157_v19 }
 0x114   :  { %268 = shalt.err (!%p265_p6)
}
 0x115   :  { %s269_s15 = scalar_lea.hbm %s368_s3, 256 }
 0x116   :  { %p270_p7 = scmp.ne.s32.totalorder %s368_s3, %s269_s15  ;;  %p273_p8 = scmp.lt.u32.totalorder %s269_s15, %s368_s3 }
 0x118   :  { %p275_p9 = pnand %p273_p8, %p270_p7 }
 0x11a   :  { %278 = shalt.err (!%p275_p9)
}
 0x11b   :  { %172 = dma.vmem_to_hbm [thread:$0]  %s167_s12, 256, %s368_s3, [#allocation5], %s286_s22, %s286_s22, %s287_s23  }
 0x11c   :  { %283 = dma.done.wait [#allocation5], 256  }
 0x11d   :  { %284 = vsyncadd [#allocation5], 4294967040 }
 0x11e   :  { %176 = vsyncpa [#allocation4], 1 }
 0x11f   :  { %177 = vsyncpa [#allocation7], 1 }
 0x120   :  { %178 = vsyncpa [#allocation5], 1 }

</bundles_post_ra>
